<compile_context>
chip_gen: v5e
topology: v5e:2x2
jax: 0.10.0
libtpu: 0.0.40
codegen_flags: <defaults>
</compile_context>

<pallas_src>
import jax
import jax.numpy as jnp
from jax.experimental import pallas as pl
from jax.experimental.pallas import tpu as pltpu


def _copy_kernel(x_ref, o_ref):
    # IdenticalPool.forward(x) == x: pure element copy through VMEM.
    o_ref[...] = x_ref[...]


def _round_up(a: int, b: int) -> int:
    return ((a + b - 1) // b) * b


def _target_block_bytes() -> int:
    """Generation-aware block size: 2 MiB (v5e), 4 MiB (v6e), 6 MiB (v7x+)."""
    try:
        kind = jax.devices()[0].device_kind.lower()
    except Exception:
        return 2 << 20
    if "v5" in kind:
        return 2 << 20
    if "v6" in kind:
        return 4 << 20
    if "v7" in kind or "7x" in kind:
        return 6 << 20
    return 2 << 20


_MIN_SPLIT_BYTES = 4 << 20  # above this, force >=4 blocks (overlap + dual-TC sharding)


def identical_pool(x: jax.Array, *, materialize: bool = True) -> jax.Array:
    """Pallas equivalent of IdenticalPool.forward: returns x unchanged."""
    if not materialize:
        # Optimal identity: no HBM round trip at all.
        return x

    orig_shape = x.shape
    dtype = x.dtype
    n = int(x.size)
    if n == 0:
        return x  # zero-size grid special case

    itemsize = jnp.dtype(dtype).itemsize
    if itemsize not in (1, 2, 4) or dtype == jnp.bool_:
        # TODO(synk): sub-byte / bool dtypes skip the Pallas copy; identity is still exact.
        return x

    block_bytes = _target_block_bytes()
    total_bytes = n * itemsize
    pack = max(8, 8 * (4 // itemsize))  # sublane pack: 8 (32b), 16 (16b), 32 (8b)

    # ---- choose a lane-dense layout with NO pad and NO output slice ----
    lanes = 0
    for cand in (1024, 512, 256, 128):
        if n % cand == 0:
            lanes = cand
            break

    if lanes:
        # 2-D lane-dense layout: (rows, lanes), lanes a multiple of 128.
        rows = n // lanes
        x_view = x.reshape(rows, lanes)
        max_rows = max(pack, (block_bytes // (lanes * itemsize)) // pack * pack)
        tile_r = min(rows, max_rows)
        if total_bytes > _MIN_SPLIT_BYTES:
            tile_r = min(tile_r, _round_up(pl.cdiv(rows, 4), pack))
        if tile_r != rows:
            tile_r = max(pack, (tile_r // pack) * pack)  # multiple of pack (or full extent)
        grid = (pl.cdiv(rows, tile_r),)          # ragged grid; Pallas masks the tail block
        block_shape = (tile_r, lanes)
        index_map = lambda i: (i, 0)
    else:
        # Rare fallback (size not a multiple of 128): flat 1-D layout, masked tail.
        x_view = x.reshape(n)
        max_elems = max(1024, (block_bytes // itemsize) // 1024 * 1024)
        tile_n = min(n, max_elems)
        if total_bytes > _MIN_SPLIT_BYTES:
            tile_n = min(tile_n, _round_up(pl.cdiv(n, 4), 1024))
        if tile_n != n:
            tile_n = max(1024, (tile_n // 1024) * 1024)  # multiple of 128 (or full extent)
        grid = (pl.cdiv(n, tile_n),)
        block_shape = (tile_n,)
        index_map = lambda i: (i,)

    # Double-buffered in + out blocks, plus headroom.
    vmem_limit = 4 * block_bytes + (8 << 20)

    out = pl.pallas_call(
        _copy_kernel,
        out_shape=jax.ShapeDtypeStruct(x_view.shape, dtype),
        grid_spec=pltpu.PrefetchScalarGridSpec(
            num_scalar_prefetch=0,
            grid=grid,
            in_specs=[pl.BlockSpec(block_shape, index_map)],
            out_specs=pl.BlockSpec(block_shape, index_map),
        ),
        compiler_params=pltpu.CompilerParams(
            dimension_semantics=("parallel",),  # shards blocks across v7x's 2 TCs
            vmem_limit_bytes=vmem_limit,
        ),
        cost_estimate=pl.CostEstimate(
            flops=0, transcendentals=0, bytes_accessed=2 * total_bytes),
    )(x_view)

    return out.reshape(orig_shape)


if __name__ == "__main__":
    # IdenticalPool has no parameters, so the only state is the example input.
    key = jax.random.PRNGKey(0)
    x = jax.random.normal(key, (2, 4, 16, 16), dtype=jnp.float32)  # NCHW

    y = identical_pool(x)
    jax.block_until_ready(y)

    assert y.shape == x.shape and y.dtype == x.dtype
    assert bool(jnp.array_equal(y, x))
    print("KERNEL_OK")
</pallas_src>

<mosaic_0001>
module attributes {stable_mosaic.version = 11 : i64} {
  func.func @_copy_kernel(%arg0: i32, %arg1: memref<2x1024xf32, #tpu.memory_space<vmem>>, %arg2: memref<2x1024xf32, #tpu.memory_space<vmem>>) attributes {dimension_semantics = [#tpu.dimension_semantics<parallel>], iteration_bounds = array<i64: 1>, scalar_prefetch = 0 : i64, scratch_operands = 0 : i64, tpu.core_type = #tpu.core_type<tc>, window_params = [{transform_indices = @transform_0, window_bounds = array<i64: 2, 1024>}, {transform_indices = @transform_1, window_bounds = array<i64: 2, 1024>}]} {
    %c0 = arith.constant 0 : index
    %c0_0 = arith.constant 0 : index
    %0 = vector.load %arg1[%c0, %c0_0] : memref<2x1024xf32, #tpu.memory_space<vmem>>, vector<2x1024xf32>
    %c0_1 = arith.constant 0 : index
    %c0_2 = arith.constant 0 : index
    %1 = vector.load %arg2[%c0_1, %c0_2] : memref<2x1024xf32, #tpu.memory_space<vmem>>, vector<2x1024xf32>
    tpu.vector_store %arg2[%c0_1, %c0_2], %0 {strides = array<i32>} : memref<2x1024xf32, #tpu.memory_space<vmem>>, vector<2x1024xf32>,
    return
  }
  func.func @transform_0(%arg0: i32) -> (i32, i32) {
    %c0_i32 = arith.constant 0 : i32
    %c0_i32_0 = arith.constant 0 : i32
    return %arg0, %c0_i32 : i32, i32
  }
  func.func @transform_1(%arg0: i32) -> (i32, i32) {
    %c0_i32 = arith.constant 0 : i32
    %c0_i32_0 = arith.constant 0 : i32
    return %arg0, %c0_i32 : i32, i32
  }
}

</mosaic_0001>

<bundles_post_ra>
// kernel: tpu_custom_call.1
= control target key start
LH: loop header
LB: loop body
LE: loop exit
PB: predicated region body
PF: predicated region fallthrough
CT: control target
= control target key end

     0   :  { %6 = vsyncpa [#allocation3], 0  ;;  %s116_s0 = inlined_call_operand.hbm [shape: f32[2,1024], index: 0, kind: input, shape index: {}]   ;;  %s117_s1 = inlined_call_operand.hbm [shape: f32[2,1024], index: 1, kind: output, shape index: {}]  }
   0x1   :  { %7 = vsyncpa [#allocation4], 0  ;;  %s13_s8 = sshll.u32 %s116_s0, 4  ;;  %s98_s9 = smov [#allocation2]   ;;  %s14_s8 = int_to_ptr.hbm [resolvable:$true] %s13_s8 }
   0x2   :  { %s15_s10 = sshll.u32 %s98_s9, 4  ;;  %s16_s10 = int_to_ptr.vmem [resolvable:$true] %s15_s10 }
   0x3   :  { %18 = dma.hbm_to_vmem [thread:$0]  %s14_s8, 256, %s16_s10, [#allocation3]  }
   0x4   :  { %94 = dma.done.wait [#allocation3], 256  }
   0x5   :  { %95 = vsyncadd [#allocation3], 4294967040  ;;  %s99_s11 = smov [#allocation5]   ;;  %s34_s15 = sshll.u32 %s117_s1, 4  ;;  %v23_v0 = vld [vmem:[#allocation2] sm:$0xff]  ;;  %v24_v1 = vld [vmem:[#allocation2 + $0x8] sm:$0xff]  ;;  %s35_s15 = int_to_ptr.hbm [resolvable:$true] %s34_s15 }
   0x6   :  { %s32_s12 = sshll.u32 %s99_s11, 4  ;;  %25 = vst [vmem:[#allocation5] sm:$0xff] %v23_v0  ;;  %s33_s12 = int_to_ptr.vmem [resolvable:$true] %s32_s12 }
   0x7   :  { %26 = vst [vmem:[#allocation5 + $0x8] sm:$0xff] %v24_v1 }
   0x8   :  { %37 = dma.vmem_to_hbm [thread:$0]  %s33_s12, 256, %s35_s15, [#allocation4]  }
   0x9   :  { %96 = dma.done.wait [#allocation4], 256  }
   0xa   :  { %97 = vsyncadd [#allocation4], 4294967040 }
   0xb   :  { %42 = vsyncpa [#allocation3], 1 }
   0xc   :  { %43 = vsyncpa [#allocation4], 1 }

</bundles_post_ra>
